<compile_context>
chip_gen: v5e
topology: v5e:2x2
jax: 0.10.0
libtpu: 0.0.40
codegen_flags: <defaults>
</compile_context>

<pallas_src>
import functools

import jax
import jax.numpy as jnp
from jax.experimental import pallas as pl
from jax.experimental.pallas import tpu as pltpu

_LANE = 128


def _round_up(x, m):
    return ((x + m - 1) // m) * m


def _pick_tile(n, cap):
    """Largest tile <= cap that divides n (n is a multiple of 128)."""
    t = cap
    while n % t != 0:
        t //= 2
    return t


# ---------------------------------------------------------------------------
# Kernel 1: feature projection, both branches, concatenated output
#   f_cat = [ seq1 @ W_gcn^T | seq2 @ W_gcn^T ]          (Np, 2*n_h)
# ---------------------------------------------------------------------------
def _project_kernel(seq1_ref, seq2_ref, wg_ref, f_ref):
    wg = wg_ref[...]
    f1 = jnp.dot(seq1_ref[...], wg, preferred_element_type=jnp.float32)
    f2 = jnp.dot(seq2_ref[...], wg, preferred_element_type=jnp.float32)
    f_ref[...] = jnp.concatenate([f1, f2], axis=1)


# ---------------------------------------------------------------------------
# Kernel 2: stream adj once for BOTH branches.
#   acc[i]  = sum_k adj[i,k] @ fts_cat[k]        (fts_cat = [fts1 | fts2], (N, 2*n_h))
#   h       = PReLU(acc + [b_gcn | b_gcn])
#   out[i]  = h @ W_eff2 + b_eff                 (columns = [sc1 | sc2], folded scorer)
# ---------------------------------------------------------------------------
def _ggd_adj_kernel(alpha_ref, beff_ref, adj_ref, fts_ref, bg_ref, weff_ref,
                    out_ref, acc_ref, *, tk, fts_resident):
    k = pl.program_id(1)

    @pl.when(k == 0)
    def _init():
        acc_ref[...] = jnp.zeros_like(acc_ref)

    if fts_resident:
        # Whole feature slab lives in VMEM (copied once); slice the k chunk.
        start = pl.multiple_of(k * tk, tk)
        fts = fts_ref[pl.ds(start, tk), :]
    else:
        # Streamed (tk, 2*n_h) tile selected by the BlockSpec index_map.
        fts = fts_ref[...]

    acc_ref[...] += jnp.dot(adj_ref[...], fts,
                            preferred_element_type=jnp.float32)

    @pl.when(k == pl.num_programs(1) - 1)
    def _finalize():
        alpha = alpha_ref[0, 0]
        h = acc_ref[...] + bg_ref[...]                       # (tm, 2*n_h)
        h = jnp.where(h > 0, h, alpha * h)                   # PReLU
        sc = jnp.dot(h, weff_ref[...],
                     preferred_element_type=jnp.float32)     # (tm, 2)
        out_ref[...] = sc + beff_ref[0, 0]


def ggd_forward(seq1, seq2, adj, params, *, tm_cap=512, tk_cap=1024,
                fts_resident_bytes=4 * 1024 * 1024):
    """seq1, seq2: (1, N, n_in); adj: (1, N, N) dense (sparse=False path)."""
    s1, s2, a = seq1[0], seq2[0], adj[0]
    N, n_in = s1.shape
    n_h = params["gcn_fc_weight"].shape[0]

    # ---- weight prep (wrapper-side layout / tiny algebra) -------------------
    wg = params["gcn_fc_weight"].T.astype(jnp.float32)             # (n_in, n_h)
    bg = params["gcn_bias"].astype(jnp.float32)                    # (n_h,)
    bg_cat = jnp.concatenate([bg, bg])[None, :]                    # (1, 2*n_h)
    # Folded scorer:  (h @ W_lin^T + b_lin).sum(1) == h @ W_lin.sum(0) + b_lin.sum()
    w_eff = params["lin_weight"].sum(axis=0).astype(jnp.float32)   # (n_h,)
    zeros = jnp.zeros_like(w_eff)
    w_eff2 = jnp.stack([jnp.concatenate([w_eff, zeros]),
                        jnp.concatenate([zeros, w_eff])], axis=1)  # (2*n_h, 2)
    b_eff = params["lin_bias"].sum().reshape(1, 1).astype(jnp.float32)
    alpha = params["prelu_a"].reshape(1, 1).astype(jnp.float32)

    # ---- pad node dim up to a lane multiple so tiles are (8,128)-legal ------
    Np = _round_up(N, _LANE)
    s1p = jnp.pad(s1.astype(jnp.float32), ((0, Np - N), (0, 0)))
    s2p = jnp.pad(s2.astype(jnp.float32), ((0, Np - N), (0, 0)))
    adj_p = jnp.pad(a.astype(jnp.float32), ((0, Np - N), (0, Np - N)))

    tm = _pick_tile(Np, min(tm_cap, Np))    # adj row tile
    tk = _pick_tile(Np, min(tk_cap, Np))    # adj col (reduction) tile
    tp = _pick_tile(Np, min(512, Np))       # projection row tile

    # ---- kernel 1: fts_cat = [seq1 @ wg | seq2 @ wg]  (one concatenated slab) ----
    fts_cat = pl.pallas_call(
        _project_kernel,
        out_shape=jax.ShapeDtypeStruct((Np, 2 * n_h), jnp.float32),
        grid_spec=pltpu.PrefetchScalarGridSpec(
            num_scalar_prefetch=0,
            grid=(Np // tp,),
            in_specs=[
                pl.BlockSpec((tp, n_in), lambda i: (i, 0)),
                pl.BlockSpec((tp, n_in), lambda i: (i, 0)),
                pl.BlockSpec((n_in, n_h), lambda i: (0, 0)),
            ],
            out_specs=pl.BlockSpec((tp, 2 * n_h), lambda i: (i, 0)),
        ),
        compiler_params=pltpu.CompilerParams(
            dimension_semantics=("parallel",)),
    )(s1p, s2p, wg)

    # ---- kernel 2: tiled adj @ fts_cat + bias + PReLU + folded scorer -------
    fts_bytes = Np * 2 * n_h * 4
    fts_resident = fts_bytes <= fts_resident_bytes
    if fts_resident:
        # Entire slab copied to VMEM once (constant block index -> single DMA),
        # avoiding the (Np/tm)x re-read across adj row tiles.
        fts_spec = pl.BlockSpec((Np, 2 * n_h), lambda i, k: (0, 0))
    else:
        fts_spec = pl.BlockSpec((tk, 2 * n_h), lambda i, k: (k, 0))

    cost = pl.CostEstimate(
        flops=2 * Np * Np * (2 * n_h) + 2 * Np * (2 * n_h) * 2,
        transcendentals=0,
        bytes_accessed=4 * (Np * Np + Np * 2 * n_h + Np * 2
                            + 2 * n_h * 2 + 2 * n_h + 2),
    )
    smem = pltpu.MemorySpace.SMEM
    out = pl.pallas_call(
        functools.partial(_ggd_adj_kernel, tk=tk, fts_resident=fts_resident),
        out_shape=jax.ShapeDtypeStruct((Np, 2), jnp.float32),
        grid_spec=pltpu.PrefetchScalarGridSpec(
            num_scalar_prefetch=0,
            grid=(Np // tm, Np // tk),
            in_specs=[
                pl.BlockSpec((1, 1), lambda i, k: (0, 0), memory_space=smem),  # prelu alpha
                pl.BlockSpec((1, 1), lambda i, k: (0, 0), memory_space=smem),  # b_eff
                pl.BlockSpec((tm, tk), lambda i, k: (i, k)),                   # adj tile
                fts_spec,                                                      # fts_cat
                pl.BlockSpec((1, 2 * n_h), lambda i, k: (0, 0)),               # [b_gcn|b_gcn]
                pl.BlockSpec((2 * n_h, 2), lambda i, k: (0, 0)),               # W_eff2
            ],
            out_specs=pl.BlockSpec((tm, 2), lambda i, k: (i, 0)),
            scratch_shapes=[pltpu.VMEM((tm, 2 * n_h), jnp.float32)],
        ),
        compiler_params=pltpu.CompilerParams(
            dimension_semantics=("parallel", "arbitrary"),
            vmem_limit_bytes=48 * 1024 * 1024,   # safe on v5e/v6e (128 MiB) and v7x (64 MiB)
        ),
        cost_estimate=cost,
    )(alpha, b_eff, adj_p, fts_cat, bg_cat, w_eff2)

    sc = out[:N]                             # (N, 2): columns = [sc_1, sc_2]
    # TODO(synk): original forward prints shapes and calls exit(0) before cat; we return logits.
    logits = sc.T.reshape(1, 2 * N)          # == torch.cat((sc_1, sc_2), dim=1)
    return logits


def _reference(seq1, seq2, adj, params):
    """Pure-JAX reference for correctness check."""
    def branch(seq):
        fts = seq[0] @ params["gcn_fc_weight"].T
        h = adj[0] @ fts + params["gcn_bias"]
        a = params["prelu_a"][0]
        h = jnp.where(h > 0, h, a * h)
        lin = h @ params["lin_weight"].T + params["lin_bias"]
        return lin.sum(axis=1)[None, :]
    return jnp.concatenate([branch(seq1), branch(seq2)], axis=1)


if __name__ == "__main__":
    # Small shapes, but big enough to exercise tiling + padding:
    # N=600 -> Np=640; with tk_cap=256 the adj grid is (5, 5) with 128x128 tiles.
    N, n_in, n_h = 600, 48, 32

    key = jax.random.PRNGKey(0)
    k1, k2, k3, k4, k5, k6, k7 = jax.random.split(key, 7)

    seq1 = jax.random.normal(k1, (1, N, n_in), dtype=jnp.float32)
    seq2 = jax.random.normal(k2, (1, N, n_in), dtype=jnp.float32)
    # Symmetric row-normalized dense adjacency (1, N, N)
    raw = jax.random.uniform(k3, (N, N), dtype=jnp.float32)
    adj_sym = (raw + raw.T) * 0.5 + jnp.eye(N, dtype=jnp.float32)
    adj = (adj_sym / adj_sym.sum(axis=1, keepdims=True))[None, :, :]

    params = {
        # GCN: nn.Linear(n_in, n_h, bias=False) weight (n_h, n_in) + explicit GCN bias.
        "gcn_fc_weight": jax.random.normal(k4, (n_h, n_in), dtype=jnp.float32) * 0.1,
        "gcn_bias": jax.random.normal(k7, (n_h,), dtype=jnp.float32) * 0.05,
        "prelu_a": jnp.array([0.25], dtype=jnp.float32),   # nn.PReLU() default
        # lin: nn.Linear(n_h, n_h)
        "lin_weight": jax.random.normal(k5, (n_h, n_h), dtype=jnp.float32) * 0.1,
        "lin_bias": jax.random.normal(k6, (n_h,), dtype=jnp.float32) * 0.1,
    }

    with jax.default_matmul_precision("highest"):
        ref = _reference(seq1, seq2, adj, params)

    # VMEM-resident feature-slab path (default) ...
    fwd_resident = jax.jit(functools.partial(ggd_forward, tk_cap=256))
    logits_r = jax.block_until_ready(fwd_resident(seq1, seq2, adj, params))
    # ... and the streaming fallback path (large-graph code path).
    fwd_stream = jax.jit(functools.partial(ggd_forward, tk_cap=256,
                                           fts_resident_bytes=0))
    logits_s = jax.block_until_ready(fwd_stream(seq1, seq2, adj, params))

    assert logits_r.shape == (1, 2 * N), logits_r.shape
    assert logits_s.shape == (1, 2 * N), logits_s.shape
    err_r = float(jnp.max(jnp.abs(logits_r - ref)))
    err_s = float(jnp.max(jnp.abs(logits_s - ref)))
    assert jnp.allclose(logits_r, ref, atol=5e-4, rtol=5e-4), err_r
    assert jnp.allclose(logits_s, ref, atol=5e-4, rtol=5e-4), err_s
    print("KERNEL_OK")
</pallas_src>

<mosaic_0001>
module attributes {stable_mosaic.version = 11 : i64} {
  func.func @_project_kernel(%arg0: i32, %arg1: memref<128x48xf32, #tpu.memory_space<vmem>>, %arg2: memref<128x48xf32, #tpu.memory_space<vmem>>, %arg3: memref<48x32xf32, #tpu.memory_space<vmem>>, %arg4: memref<128x64xf32, #tpu.memory_space<vmem>>) attributes {dimension_semantics = [#tpu.dimension_semantics<parallel>], iteration_bounds = array<i64: 5>, scalar_prefetch = 0 : i64, scratch_operands = 0 : i64, tpu.core_type = #tpu.core_type<tc>, window_params = [{transform_indices = @transform_0, window_bounds = array<i64: 128, 48>}, {transform_indices = @transform_1, window_bounds = array<i64: 128, 48>}, {pipeline_mode = #tpu.pipeline_mode<synchronous>, transform_indices = @transform_2, window_bounds = array<i64: 48, 32>}, {transform_indices = @transform_3, window_bounds = array<i64: 128, 64>}]} {
    %c0 = arith.constant 0 : index
    %c0_0 = arith.constant 0 : index
    %0 = vector.load %arg3[%c0, %c0_0] : memref<48x32xf32, #tpu.memory_space<vmem>>, vector<48x32xf32>
    %c0_1 = arith.constant 0 : index
    %c0_2 = arith.constant 0 : index
    %1 = vector.load %arg1[%c0_1, %c0_2] : memref<128x48xf32, #tpu.memory_space<vmem>>, vector<128x48xf32>
    %cst = arith.constant dense<0.000000e+00> : vector<128x32xf32>
    %2 = tpu.matmul %1, %0, %cst {dimension_numbers = #tpu.dot_dimension_numbers<[1], [0], [0], [1], [0, 0, 1, 1], [], []>} : vector<128x48xf32>, vector<48x32xf32>, vector<128x32xf32> -> vector<128x32xf32>
    %c0_3 = arith.constant 0 : index
    %c0_4 = arith.constant 0 : index
    %3 = vector.load %arg2[%c0_3, %c0_4] : memref<128x48xf32, #tpu.memory_space<vmem>>, vector<128x48xf32>
    %cst_5 = arith.constant dense<0.000000e+00> : vector<128x32xf32>
    %4 = tpu.matmul %3, %0, %cst_5 {dimension_numbers = #tpu.dot_dimension_numbers<[1], [0], [0], [1], [0, 0, 1, 1], [], []>} : vector<128x48xf32>, vector<48x32xf32>, vector<128x32xf32> -> vector<128x32xf32>
    %5 = tpu.concatenate %2, %4 in 1 : vector<128x32xf32>, vector<128x32xf32> -> vector<128x64xf32>
    %c0_6 = arith.constant 0 : index
    %c0_7 = arith.constant 0 : index
    %6 = vector.load %arg4[%c0_6, %c0_7] : memref<128x64xf32, #tpu.memory_space<vmem>>, vector<128x64xf32>
    tpu.vector_store %arg4[%c0_6, %c0_7], %5 {strides = array<i32>} : memref<128x64xf32, #tpu.memory_space<vmem>>, vector<128x64xf32>,
    return
  }
  func.func @transform_0(%arg0: i32) -> (i32, i32) {
    %c0_i32 = arith.constant 0 : i32
    %c0_i32_0 = arith.constant 0 : i32
    return %arg0, %c0_i32 : i32, i32
  }
  func.func @transform_1(%arg0: i32) -> (i32, i32) {
    %c0_i32 = arith.constant 0 : i32
    %c0_i32_0 = arith.constant 0 : i32
    return %arg0, %c0_i32 : i32, i32
  }
  func.func @transform_2(%arg0: i32) -> (i32, i32) {
    %c0_i32 = arith.constant 0 : i32
    %c0_i32_0 = arith.constant 0 : i32
    %c0_i32_1 = arith.constant 0 : i32
    return %c0_i32, %c0_i32_0 : i32, i32
  }
  func.func @transform_3(%arg0: i32) -> (i32, i32) {
    %c0_i32 = arith.constant 0 : i32
    %c0_i32_0 = arith.constant 0 : i32
    return %arg0, %c0_i32 : i32, i32
  }
}

module attributes {stable_mosaic.version = 11 : i64} {
  func.func @_ggd_adj_kernel(%arg0: i32, %arg1: i32, %arg2: memref<1x1xf32, #tpu.memory_space<smem>>, %arg3: memref<1x1xf32, #tpu.memory_space<smem>>, %arg4: memref<128x128xf32, #tpu.memory_space<vmem>>, %arg5: memref<640x64xf32, #tpu.memory_space<vmem>>, %arg6: memref<1x64xf32, #tpu.memory_space<vmem>>, %arg7: memref<64x2xf32, #tpu.memory_space<vmem>>, %arg8: memref<128x2xf32, #tpu.memory_space<vmem>>, %arg9: memref<128x64xf32, #tpu.memory_space<vmem>>) attributes {dimension_semantics = [#tpu.dimension_semantics<parallel>, #tpu.dimension_semantics<arbitrary>], iteration_bounds = array<i64: 5, 5>, scalar_prefetch = 0 : i64, scratch_operands = 1 : i64, tpu.core_type = #tpu.core_type<tc>, window_params = [{transform_indices = @transform_0, window_bounds = array<i64: 1, 1>}, {transform_indices = @transform_1, window_bounds = array<i64: 1, 1>}, {transform_indices = @transform_2, window_bounds = array<i64: 128, 128>}, {pipeline_mode = #tpu.pipeline_mode<synchronous>, transform_indices = @transform_3, window_bounds = array<i64: 640, 64>}, {pipeline_mode = #tpu.pipeline_mode<synchronous>, transform_indices = @transform_4, window_bounds = array<i64: 1, 64>}, {pipeline_mode = #tpu.pipeline_mode<synchronous>, transform_indices = @transform_5, window_bounds = array<i64: 64, 2>}, {transform_indices = @transform_6, window_bounds = array<i64: 128, 2>}]} {
    %c0_i32 = arith.constant 0 : i32
    %0 = arith.cmpi eq, %arg1, %c0_i32 : i32
    %1 = arith.extui %0 : i1 to i32
    %c0_i32_0 = arith.constant 0 : i32
    %2 = arith.cmpi ne, %1, %c0_i32_0 : i32
    scf.if %2 {
      %cst_8 = arith.constant 0.000000e+00 : f32
      %15 = vector.broadcast %cst_8 : f32 to vector<128x64xf32>
      %c0_9 = arith.constant 0 : index
      %c0_10 = arith.constant 0 : index
      %16 = vector.load %arg9[%c0_9, %c0_10] : memref<128x64xf32, #tpu.memory_space<vmem>>, vector<128x64xf32>
      tpu.vector_store %arg9[%c0_9, %c0_10], %15 {strides = array<i32>} : memref<128x64xf32, #tpu.memory_space<vmem>>, vector<128x64xf32>,
    } else {
    }
    %c128_i32 = arith.constant 128 : i32
    %3 = arith.muli %arg1, %c128_i32 : i32
    %4 = tpu.assume_multiple %3, 128 : i32
    %5 = arith.index_cast %4 : i32 to index
    %c0 = arith.constant 0 : index
    %6 = vector.load %arg5[%5, %c0] : memref<640x64xf32, #tpu.memory_space<vmem>>, vector<128x64xf32>
    %c0_1 = arith.constant 0 : index
    %c0_2 = arith.constant 0 : index
    %7 = vector.load %arg9[%c0_1, %c0_2] : memref<128x64xf32, #tpu.memory_space<vmem>>, vector<128x64xf32>
    %c0_3 = arith.constant 0 : index
    %c0_4 = arith.constant 0 : index
    %8 = vector.load %arg4[%c0_3, %c0_4] : memref<128x128xf32, #tpu.memory_space<vmem>>, vector<128x128xf32>
    %cst = arith.constant dense<0.000000e+00> : vector<128x64xf32>
    %9 = tpu.matmul %8, %6, %cst {dimension_numbers = #tpu.dot_dimension_numbers<[1], [0], [0], [1], [0, 0, 1, 1], [], []>} : vector<128x128xf32>, vector<128x64xf32>, vector<128x64xf32> -> vector<128x64xf32>
    %10 = arith.addf %7, %9 : vector<128x64xf32>
    %c0_5 = arith.constant 0 : index
    %c0_6 = arith.constant 0 : index
    %11 = vector.load %arg9[%c0_5, %c0_6] : memref<128x64xf32, #tpu.memory_space<vmem>>, vector<128x64xf32>
    tpu.vector_store %arg9[%c0_5, %c0_6], %10 {strides = array<i32>} : memref<128x64xf32, #tpu.memory_space<vmem>>, vector<128x64xf32>,
    %c4_i32 = arith.constant 4 : i32
    %12 = arith.cmpi eq, %arg1, %c4_i32 : i32
    %13 = arith.extui %12 : i1 to i32
    %c0_i32_7 = arith.constant 0 : i32
    %14 = arith.cmpi ne, %13, %c0_i32_7 : i32
    scf.if %14 {
      %c0_8 = arith.constant 0 : index
      %c0_9 = arith.constant 0 : index
      %15 = memref.load %arg2[%c0_8, %c0_9] : memref<1x1xf32, #tpu.memory_space<smem>>
      %c0_10 = arith.constant 0 : index
      %c0_11 = arith.constant 0 : index
      %16 = vector.load %arg9[%c0_10, %c0_11] : memref<128x64xf32, #tpu.memory_space<vmem>>, vector<128x64xf32>
      %c0_12 = arith.constant 0 : index
      %c0_13 = arith.constant 0 : index
      %17 = vector.load %arg6[%c0_12, %c0_13] : memref<1x64xf32, #tpu.memory_space<vmem>>, vector<1x64xf32>
      %18 = vector.broadcast %17 : vector<1x64xf32> to vector<128x64xf32>
      %19 = arith.addf %16, %18 : vector<128x64xf32>
      %cst_14 = arith.constant 0.000000e+00 : f32
      %20 = vector.broadcast %cst_14 : f32 to vector<128x64xf32>
      %21 = arith.cmpf ogt, %19, %20 : vector<128x64xf32>
      %22 = vector.broadcast %15 : f32 to vector<128x64xf32>
      %23 = arith.mulf %22, %19 : vector<128x64xf32>
      %24 = arith.select %21, %19, %23 : vector<128x64xi1>, vector<128x64xf32>
      %c0_15 = arith.constant 0 : index
      %c0_16 = arith.constant 0 : index
      %25 = vector.load %arg7[%c0_15, %c0_16] : memref<64x2xf32, #tpu.memory_space<vmem>>, vector<64x2xf32>
      %cst_17 = arith.constant dense<0.000000e+00> : vector<128x2xf32>
      %26 = tpu.matmul %24, %25, %cst_17 {dimension_numbers = #tpu.dot_dimension_numbers<[1], [0], [0], [1], [0, 0, 1, 1], [], []>} : vector<128x64xf32>, vector<64x2xf32>, vector<128x2xf32> -> vector<128x2xf32>
      %c0_18 = arith.constant 0 : index
      %c0_19 = arith.constant 0 : index
      %27 = memref.load %arg3[%c0_18, %c0_19] : memref<1x1xf32, #tpu.memory_space<smem>>
      %28 = vector.broadcast %27 : f32 to vector<128x2xf32>
      %29 = arith.addf %26, %28 : vector<128x2xf32>
      %c0_20 = arith.constant 0 : index
      %c0_21 = arith.constant 0 : index
      %30 = vector.load %arg8[%c0_20, %c0_21] : memref<128x2xf32, #tpu.memory_space<vmem>>, vector<128x2xf32>
      tpu.vector_store %arg8[%c0_20, %c0_21], %29 {strides = array<i32>} : memref<128x2xf32, #tpu.memory_space<vmem>>, vector<128x2xf32>,
    } else {
    }
    return
  }
  func.func @transform_0(%arg0: i32, %arg1: i32) -> (i32, i32) {
    %c0_i32 = arith.constant 0 : i32
    %c0_i32_0 = arith.constant 0 : i32
    %c0_i32_1 = arith.constant 0 : i32
    return %c0_i32, %c0_i32_0 : i32, i32
  }
  func.func @transform_1(%arg0: i32, %arg1: i32) -> (i32, i32) {
    %c0_i32 = arith.constant 0 : i32
    %c0_i32_0 = arith.constant 0 : i32
    %c0_i32_1 = arith.constant 0 : i32
    return %c0_i32, %c0_i32_0 : i32, i32
  }
  func.func @transform_2(%arg0: i32, %arg1: i32) -> (i32, i32) {
    %c0_i32 = arith.constant 0 : i32
    return %arg0, %arg1 : i32, i32
  }
  func.func @transform_3(%arg0: i32, %arg1: i32) -> (i32, i32) {
    %c0_i32 = arith.constant 0 : i32
    %c0_i32_0 = arith.constant 0 : i32
    %c0_i32_1 = arith.constant 0 : i32
    return %c0_i32, %c0_i32_0 : i32, i32
  }
  func.func @transform_4(%arg0: i32, %arg1: i32) -> (i32, i32) {
    %c0_i32 = arith.constant 0 : i32
    %c0_i32_0 = arith.constant 0 : i32
    %c0_i32_1 = arith.constant 0 : i32
    return %c0_i32, %c0_i32_0 : i32, i32
  }
  func.func @transform_5(%arg0: i32, %arg1: i32) -> (i32, i32) {
    %c0_i32 = arith.constant 0 : i32
    %c0_i32_0 = arith.constant 0 : i32
    %c0_i32_1 = arith.constant 0 : i32
    return %c0_i32, %c0_i32_0 : i32, i32
  }
  func.func @transform_6(%arg0: i32, %arg1: i32) -> (i32, i32) {
    %c0_i32 = arith.constant 0 : i32
    %c0_i32_0 = arith.constant 0 : i32
    return %arg0, %c0_i32 : i32, i32
  }
}

</mosaic_0001>

<bundles_post_ra>
// kernel: ggd_forward.2
= control target key start
LH: loop header
LB: loop body
LE: loop exit
PB: predicated region body
PF: predicated region fallthrough
CT: control target
= control target key end

     0   :  { %s722_s12 = smov 0   ;;  %s899_s0 = inlined_call_operand.vmem [shape: f32[640,48], index: 0, kind: input, shape index: {}]   ;;  %s900_s1 = inlined_call_operand.vmem [shape: f32[640,48], index: 1, kind: input, shape index: {}]   ;;  %s901_s2 = inlined_call_operand.vmem [shape: f32[48,32], index: 2, kind: input, shape index: {}]   ;;  %s902_s3 = inlined_call_operand.vmem [shape: f32[640,64], index: 3, kind: output, shape index: {}]  }
   0x1 LB: > { %s627_s13 = sadd.s32 4294967295, %s699_s12   ;;  %p631_p0 = scmp.ge.s32.totalorder %s699_s12, 1  ;;  %s699_s12 = sphi %s722_s12, %s13_s12  }
   0x2   : > { %p149_p1 = scmp.lt.s32.totalorder %s699_s12, 6 }
   0x4   : > { %p150_p2 = pnand %p631_p0, %p149_p1 }
   0x5   : > { %s632_s18 = sshll.u32 (!%p150_p2), %s627_s13, 4  ;;  %s701_s7 = smov (!%p150_p2), 32  }
   0x6   : > { %153 = sbr.rel (%p150_p2) target bundleno = 330 (0x14a), region = 32  ;;  %p179_p3 = scmp.lt.s32.totalorder (!%p150_p2), %s632_s18, 79 }
   0xb   : > { %v201_v0 = vld [vmem:[%s901_s2 + $0x28] sm:$0xff]  ;;  %v200_v1 = vld [vmem:[%s901_s2 + $0x20] sm:$0xff]  ;;  %v199_v2 = vld [vmem:[%s901_s2 + $0x18] sm:$0xff]  ;;  %s904_s18 = smov (!%p179_p3, %s632_s18), 79  ;;  %vm218_vm0 = vcmask 392192   ;;  %vm525_vm1 = vcmask 261120  }
   0xc   : > { %406 = vmatpush.msra.mxu1 %v201_v0  ;;  %678 = vmatpush.msra.mxu3 %v201_v0  ;;  %v198_v3 = vld [vmem:[%s901_s2 + $0x10] sm:$0xff]  ;;  %s742_s23 = sshll.u32 %s904_s18, 3  ;;  %v197_v4 = vld [vmem:[%s901_s2 + $0x8] sm:$0xff]  ;;  %v196_v5 = vld [vmem:[%s901_s2] sm:$0xff]  ;;  %vm542_vm2 = vcmask 523264  }
   0xd   : > { %672 = vmatpush.msra.mxu2 %v201_v0  ;;  %277 = vmatpush.msra.mxu0 %v201_v0  ;;  %s751_s28 = scalar_lea.vmem %s900_s1, %s742_s23  ;;  %s774_s6 = scalar_lea.vmem %s899_s0, %s742_s23 }
   0xe   : > { %407 = vmatpush.msra.mxu1 %v200_v1  ;;  %679 = vmatpush.msra.mxu3 %v200_v1  ;;  %v332_v6 = vld [vmem:[%s751_s28] sm:$0xff]  ;;  %v333_v8 = vld [vmem:[%s751_s28 + $0x8] sm:$0xff]  ;;  %v334_v10 = vld [vmem:[%s751_s28 + $0x10] sm:$0xff]  ;;  %s846_s10 = scalar_lea.vmem %s902_s3, %s742_s23 }
   0xf   : > { %673 = vmatpush.msra.mxu2 %v200_v1  ;;  %278 = vmatpush.msra.mxu0 %v200_v1  ;;  %v340_v7 = vld [vmem:[%s751_s28 + $0x40] sm:$0xff]  ;;  %v341_v9 = vld [vmem:[%s751_s28 + $0x48] sm:$0xff]  ;;  %v342_v11 = vld [vmem:[%s751_s28 + $0x50] sm:$0xff] }
  0x10   : > { %408 = vmatpush.msra.mxu1 %v199_v2  ;;  %680 = vmatpush.msra.mxu3 %v199_v2  ;;  %v335_v12 = vld [vmem:[%s751_s28 + $0x18] sm:$0xff]  ;;  %v210_v14 = vld [vmem:[%s774_s6 + $0x40] sm:$0xff]  ;;  %v211_v18 = vld [vmem:[%s774_s6 + $0x48] sm:$0xff] }
  0x11   : > { %674 = vmatpush.msra.mxu2 %v199_v2  ;;  %279 = vmatpush.msra.mxu0 %v199_v2  ;;  %v343_v13 = vld [vmem:[%s751_s28 + $0x58] sm:$0xff]  ;;  %v202_v15 = vld [vmem:[%s774_s6] sm:$0xff]  ;;  %v203_v19 = vld [vmem:[%s774_s6 + $0x8] sm:$0xff] }
  0x12   : > { %409 = vmatpush.msra.mxu1 %v198_v3  ;;  %681 = vmatpush.msra.mxu3 %v198_v3  ;;  %v336_v16 = vld [vmem:[%s751_s28 + $0x20] sm:$0xff]  ;;  %v337_v20 = vld [vmem:[%s751_s28 + $0x28] sm:$0xff]  ;;  %v212_v22 = vld [vmem:[%s774_s6 + $0x50] sm:$0xff] }
  0x13   : > { %675 = vmatpush.msra.mxu2 %v198_v3  ;;  %280 = vmatpush.msra.mxu0 %v198_v3  ;;  %v344_v17 = vld [vmem:[%s751_s28 + $0x60] sm:$0xff]  ;;  %v345_v21 = vld [vmem:[%s751_s28 + $0x68] sm:$0xff]  ;;  %v204_v23 = vld [vmem:[%s774_s6 + $0x10] sm:$0xff] }
  0x14   : > { %410 = vmatpush.msra.mxu1 %v197_v4  ;;  %682 = vmatpush.msra.mxu3 %v197_v4  ;;  %v338_v24 = vld [vmem:[%s751_s28 + $0x30] sm:$0xff]  ;;  %v213_v26 = vld [vmem:[%s774_s6 + $0x58] sm:$0xff]  ;;  %v214_v30 = vld [vmem:[%s774_s6 + $0x60] sm:$0xff] }
  0x15   : > { %676 = vmatpush.msra.mxu2 %v197_v4  ;;  %281 = vmatpush.msra.mxu0 %v197_v4  ;;  %v346_v25 = vld [vmem:[%s751_s28 + $0x70] sm:$0xff]  ;;  %v205_v27 = vld [vmem:[%s774_s6 + $0x18] sm:$0xff]  ;;  %v206_v31 = vld [vmem:[%s774_s6 + $0x20] sm:$0xff] }
  0x16   : > { %411 = vmatpush.msra.mxu1 %v196_v5  ;;  %683 = vmatpush.msra.mxu3 %v196_v5  ;;  %v339_v28 = vld [vmem:[%s751_s28 + $0x38] sm:$0xff]  ;;  %v215_v32 = vld [vmem:[%s774_s6 + $0x68] sm:$0xff]  ;;  %v216_v34 = vld [vmem:[%s774_s6 + $0x70] sm:$0xff] }
  0x17   : > { %654 = vmatmul.msk.f32.vlgmr.msra.gmra.mxu1 %vm218_vm0, %v332_v6  ;;  %662 = vmatmul.msk.f32.vlgmr.msra.gmra.mxu3 %vm218_vm0, %v340_v7  ;;  %v347_v29 = vld [vmem:[%s751_s28 + $0x78] sm:$0xff]  ;;  %v207_v33 = vld [vmem:[%s774_s6 + $0x28] sm:$0xff]  ;;  %v208_v36 = vld [vmem:[%s774_s6 + $0x30] sm:$0xff] }
  0x18   : > { %677 = vmatpush.msra.mxu2 %v196_v5  ;;  %282 = vmatpush.msra.mxu0 %v196_v5  ;;  %v209_v39 = vld [vmem:[%s774_s6 + $0x38] sm:$0xff] }
  0x19   : > { %646 = vmatmul.msk.f32.vlgmr.msra.gmra.mxu2 %vm218_vm0, %v210_v14  ;;  %638 = vmatmul.msk.f32.vlgmr.msra.gmra.mxu0 %vm218_vm0, %v202_v15  ;;  %v217_v41 = vld [vmem:[%s774_s6 + $0x78] sm:$0xff] }
  0x1f   : > { %655 = vmatmul.msk.f32.gmra.mxu1 %vm218_vm0, %v333_v8  ;;  %663 = vmatmul.msk.f32.gmra.mxu3 %vm218_vm0, %v341_v9 }
  0x21   : > { %647 = vmatmul.msk.f32.gmra.mxu2 %vm218_vm0, %v211_v18  ;;  %639 = vmatmul.msk.f32.gmra.mxu0 %vm218_vm0, %v203_v19 }
  0x27   : > { %656 = vmatmul.msk.f32.gmra.mxu1 %vm218_vm0, %v334_v10  ;;  %664 = vmatmul.msk.f32.gmra.mxu3 %vm218_vm0, %v342_v11 }
  0x29   : > { %648 = vmatmul.msk.f32.gmra.mxu2 %vm218_vm0, %v212_v22  ;;  %640 = vmatmul.msk.f32.gmra.mxu0 %vm218_vm0, %v204_v23 }
  0x2f   : > { %657 = vmatmul.msk.f32.gmra.mxu1 %vm218_vm0, %v335_v12  ;;  %665 = vmatmul.msk.f32.gmra.mxu3 %vm218_vm0, %v343_v13 }
  0x31   : > { %649 = vmatmul.msk.f32.gmra.mxu2 %vm218_vm0, %v213_v26  ;;  %641 = vmatmul.msk.f32.gmra.mxu0 %vm218_vm0, %v205_v27 }
  0x37   : > { %658 = vmatmul.msk.f32.gmra.mxu1 %vm218_vm0, %v336_v16  ;;  %666 = vmatmul.msk.f32.gmra.mxu3 %vm218_vm0, %v344_v17 }
  0x39   : > { %650 = vmatmul.msk.f32.gmra.mxu2 %vm218_vm0, %v214_v30  ;;  %642 = vmatmul.msk.f32.gmra.mxu0 %vm218_vm0, %v206_v31 }
  0x3f   : > { %659 = vmatmul.msk.f32.gmra.mxu1 %vm218_vm0, %v337_v20  ;;  %667 = vmatmul.msk.f32.gmra.mxu3 %vm218_vm0, %v345_v21 }
  0x41   : > { %651 = vmatmul.msk.f32.gmra.mxu2 %vm218_vm0, %v215_v32  ;;  %643 = vmatmul.msk.f32.gmra.mxu0 %vm218_vm0, %v207_v33 }
  0x47   : > { %660 = vmatmul.msk.f32.gmra.mxu1 %vm218_vm0, %v338_v24  ;;  %668 = vmatmul.msk.f32.gmra.mxu3 %vm218_vm0, %v346_v25 }
  0x49   : > { %652 = vmatmul.msk.f32.gmra.mxu2 %vm218_vm0, %v216_v34  ;;  %644 = vmatmul.msk.f32.gmra.mxu0 %vm218_vm0, %v208_v36 }
  0x4f   : > { %661 = vmatmul.msk.f32.gmra.mxu1 %vm218_vm0, %v339_v28  ;;  %669 = vmatmul.msk.f32.gmra.mxu3 %vm218_vm0, %v347_v29 }
  0x51   : > { %645 = vmatmul.msk.f32.gmra.mxu0 %vm218_vm0, %v209_v39  ;;  %653 = vmatmul.msk.f32.gmra.mxu2 %vm218_vm0, %v217_v41 }
  0x94   : > { %v413_v35 = vpop.f32.mrf.mxu1 }
  0x95   : > { %477 = vrot.lane.b32.xlu0 %v413_v35, %s701_s7 }
  0x96   : > { %v284_v55 = vpop.f32.mrf.mxu0 }
  0x9a   : > { %v437_v37 = vpop.f32.mrf.mxu3 }
  0x9b   : > { %493 = vrot.lane.b32.xlu2 %v437_v37, %s701_s7 }
  0x9c   : > { %v416_v38 = vpop.f32.mrf.mxu1  ;;  %v308_v54 = vpop.f32.mrf.mxu2 }
  0x9d   : > { %479 = vrot.lane.b32.xlu0 %v416_v38, %s701_s7 }
  0x9e   : > { %v287_v57 = vpop.f32.mrf.mxu0 }
  0xa2   : > { %v440_v40 = vpop.f32.mrf.mxu3 }
  0xa4   : > { %v419_v42 = vpop.f32.mrf.mxu1  ;;  %v311_v56 = vpop.f32.mrf.mxu2 }
  0xa5   : > { %495 = vrot.lane.b32.xlu0 %v440_v40, %s701_s7  ;;  %481 = vrot.lane.b32.xlu1 %v419_v42, %s701_s7 }
  0xa6   : > { %v290_v61 = vpop.f32.mrf.mxu0 }
  0xaa   : > { %v443_v43 = vpop.f32.mrf.mxu3 }
  0xac   : > { %v422_v44 = vpop.f32.mrf.mxu1  ;;  %v314_v60 = vpop.f32.mrf.mxu2 }
  0xad   : > { %497 = vrot.lane.b32.xlu1 %v443_v43, %s701_s7 }
  0xae   : > { %v293_v0 = vpop.f32.mrf.mxu0 }
  0xb2   : > { %v446_v45 = vpop.f32.mrf.mxu3 }
  0xb3   : > { %499 = vrot.lane.b32.xlu2 %v446_v45, %s701_s7 }
  0xb4   : > { %v425_v46 = vpop.f32.mrf.mxu1  ;;  %v317_v62 = vpop.f32.mrf.mxu2 }
  0xb5   : > { %483 = vrot.lane.b32.xlu1 %v422_v44, %s701_s7 }
  0xb6   : > { %v296_v7 = vpop.f32.mrf.mxu0 }
  0xba   : > { %v449_v47 = vpop.f32.mrf.mxu3 }
  0xbb   : > { %485 = vrot.lane.b32.xlu2 %v425_v46, %s701_s7  ;;  %501 = vrot.lane.b32.xlu0 %v449_v47, %s701_s7 }
  0xbc   : > { %v428_v48 = vpop.f32.mrf.mxu1  ;;  %v320_v5 = vpop.f32.mrf.mxu2 }
  0xbe   : > { %v299_v15 = vpop.f32.mrf.mxu0 }
  0xc2   : > { %v452_v49 = vpop.f32.mrf.mxu3 }
  0xc3   : > { %487 = vrot.lane.b32.xlu2 %v428_v48, %s701_s7 }
  0xc4   : > { %v431_v50 = vpop.f32.mrf.mxu1  ;;  %v323_v14 = vpop.f32.mrf.mxu2 }
  0xc5   : > { %489 = vrot.lane.b32.xlu0 %v431_v50, %s701_s7 }
  0xc6   : > { %v302_v27 = vpop.f32.mrf.mxu0 }
  0xca   : > { %v455_v51 = vpop.f32.mrf.mxu3 }
  0xcb   : > { %505 = vrot.lane.b32.xlu2 %v455_v51, %s701_s7 }
  0xcc   : > { %v434_v52 = vpop.f32.mrf.mxu1  ;;  %v326_v20 = vpop.f32.mrf.mxu2 }
  0xcd   : > { %491 = vrot.lane.b32.xlu1 %v434_v52, %s701_s7 }
  0xce   : > { %v305_v30 = vpop.f32.mrf.mxu0 }
  0xd2   : > { %v458_v53 = vpop.f32.mrf.mxu3 }
  0xd3   : > { %507 = vrot.lane.b32.xlu0 %v458_v53, %s701_s7 }
  0xd4   : > { %v329_v33 = vpop.f32.mrf.mxu2 }
  0xd5   : > { %503 = vrot.lane.b32.xlu1 %v452_v49, %s701_s7 }
  0xf5   : > { %v494_v58 = vpop.permute.xlu2 %493 }
  0xf6   : > { %v534_v59 = vsel %vm525_vm1, %v308_v54, %v494_v58 }
  0xf7   : > { %551 = vst.msk [vmem:[%s846_s10 + $0x40] sm:$0xff] %vm542_vm2, %v534_v59 }
 0x107   : > { %v478_v63 = vpop.permute.xlu0 %477 }
 0x108   : > { %v526_v1 = vsel %vm525_vm1, %v284_v55, %v478_v63 }
 0x109   : > { %543 = vst.msk [vmem:[%s846_s10] sm:$0xff] %vm542_vm2, %v526_v1 }
 0x10d   : > { %v500_v2 = vpop.permute.xlu2 %499 }
 0x10e   : > { %v537_v3 = vsel %vm525_vm1, %v317_v62, %v500_v2 }
 0x10f   : > { %v480_v4 = vpop.permute.xlu0 %479  ;;  %554 = vst.msk [vmem:[%s846_s10 + $0x58] sm:$0xff] %vm542_vm2, %v537_v3 }
 0x110   : > { %v527_v6 = vsel %vm525_vm1, %v287_v57, %v480_v4 }
 0x111   : > { %544 = vst.msk [vmem:[%s846_s10 + $0x8] sm:$0xff] %vm542_vm2, %v527_v6 }
 0x115   : > { %v486_v8 = vpop.permute.xlu2 %485 }
 0x116   : > { %v530_v9 = vsel %vm525_vm1, %v296_v7, %v486_v8 }
 0x117   : > { %547 = vst.msk [vmem:[%s846_s10 + $0x20] sm:$0xff] %vm542_vm2, %v530_v9  ;;  %v496_v10 = vpop.permute.xlu0 %495  ;;  %v482_v11 = vpop.permute.xlu1 %481 }
 0x118   : > { %v535_v12 = vsel %vm525_vm1, %v311_v56, %v496_v10  ;;  %v528_v13 = vsel %vm525_vm1, %v290_v61, %v482_v11 }
 0x119   : > { %552 = vst.msk [vmem:[%s846_s10 + $0x48] sm:$0xff] %vm542_vm2, %v535_v12 }
 0x11a   : > { %545 = vst.msk [vmem:[%s846_s10 + $0x10] sm:$0xff] %vm542_vm2, %v528_v13 }
 0x11d   : > { %v488_v16 = vpop.permute.xlu2 %487 }
 0x11e   : > { %v531_v17 = vsel %vm525_vm1, %v299_v15, %v488_v16 }
 0x11f   : > { %548 = vst.msk [vmem:[%s846_s10 + $0x28] sm:$0xff] %vm542_vm2, %v531_v17  ;;  %v498_v18 = vpop.permute.xlu1 %497 }
 0x120   : > { %v536_v19 = vsel %vm525_vm1, %v314_v60, %v498_v18 }
 0x121   : > { %553 = vst.msk [vmem:[%s846_s10 + $0x50] sm:$0xff] %vm542_vm2, %v536_v19 }
 0x125   : > { %v506_v21 = vpop.permute.xlu2 %505 }
 0x126   : > { %v540_v22 = vsel %vm525_vm1, %v326_v20, %v506_v21 }
 0x127   : > { %v484_v23 = vpop.permute.xlu1 %483  ;;  %557 = vst.msk [vmem:[%s846_s10 + $0x70] sm:$0xff] %vm542_vm2, %v540_v22 }
 0x128   : > { %v529_v24 = vsel %vm525_vm1, %v293_v0, %v484_v23 }
 0x129   : > { %546 = vst.msk [vmem:[%s846_s10 + $0x18] sm:$0xff] %vm542_vm2, %v529_v24 }
 0x12d   : > { %v502_v25 = vpop.permute.xlu0 %501 }
 0x12e   : > { %v538_v26 = vsel %vm525_vm1, %v320_v5, %v502_v25 }
 0x12f   : > { %555 = vst.msk [vmem:[%s846_s10 + $0x60] sm:$0xff] %vm542_vm2, %v538_v26 }
 0x137   : > { %v490_v28 = vpop.permute.xlu0 %489 }
 0x138   : > { %v532_v29 = vsel %vm525_vm1, %v302_v27, %v490_v28 }
 0x139   : > { %549 = vst.msk [vmem:[%s846_s10 + $0x30] sm:$0xff] %vm542_vm2, %v532_v29 }
 0x13f   : > { %v492_v31 = vpop.permute.xlu1 %491 }
 0x140   : > { %v533_v32 = vsel %vm525_vm1, %v305_v30, %v492_v31 }
 0x141   : > { %550 = vst.msk [vmem:[%s846_s10 + $0x38] sm:$0xff] %vm542_vm2, %v533_v32 }
 0x145   : > { %v508_v34 = vpop.permute.xlu0 %507 }
 0x146   : > { %v541_v35 = vsel %vm525_vm1, %v329_v33, %v508_v34 }
 0x147   : > { %v504_v36 = vpop.permute.xlu1 %503  ;;  %558 = vst.msk [vmem:[%s846_s10 + $0x78] sm:$0xff] %vm542_vm2, %v541_v35 }
 0x148   : > { %v539_v37 = vsel %vm525_vm1, %v323_v14, %v504_v36 }
 0x149   : > { %556 = vst.msk [vmem:[%s846_s10 + $0x68] sm:$0xff] %vm542_vm2, %v539_v37 }
 0x14a PF: > { %s13_s12 = sadd.s32 1, %s699_s12  }
 0x14b   : > { %p10_p4 = scmp.ge.s32.totalorder %s13_s12, 7  }
 0x14d   :  { %12 = sbr.rel (!%p10_p4) target bundleno = 1 (0x1), region = 65 }

// kernel: ggd_forward.3
= control target key start
LH: loop header
LB: loop body
LE: loop exit
PB: predicated region body
PF: predicated region fallthrough
CT: control target
= control target key end

     0   :  { %s1403_s0 = inlined_call_operand.<no memory space> [shape: f32[1,1], index: 0, kind: input, shape index: {}]   ;;  %s1404_s1 = inlined_call_operand.<no memory space> [shape: f32[1,1], index: 1, kind: input, shape index: {}]   ;;  %s1405_s2 = inlined_call_operand.vmem [shape: f32[640,640], index: 2, kind: input, shape index: {}]   ;;  %s1406_s3 = inlined_call_operand.vmem [shape: f32[640,64], index: 3, kind: input, shape index: {}]   ;;  %s1407_s4 = inlined_call_operand.vmem [shape: f32[1,64], index: 4, kind: input, shape index: {}]   ;;  %s1408_s5 = inlined_call_operand.vmem [shape: f32[64,2], index: 5, kind: input, shape index: {}]   ;;  %s1409_s6 = inlined_call_operand.vmem [shape: f32[640,2], index: 6, kind: output, shape index: {}]  }
   0x1   :  { %11 = sst [smem:[#allocation3]] %s1403_s0 }
   0x2   :  { %12 = sst [smem:[#allocation4]] %s1404_s1 }
   0x3   :  { %s1107_s25 = smov 0   ;;  %s1109_s26 = smov 0  }
   0x4   :  { %s1111_s27 = smov 0   ;;  %s1113_s28 = smov 0  }
   0x5   :  { %s1115_s29 = smov 0   ;;  %s1117_s30 = smov 0  }
   0x6   :  { %s1119_s7 = smov 0  }
   0x7 LB: > { %s27_s0 = sadd.s32 1, %s1055_s29  ;;  %s30_s1 = sadd.s32 1, %s1059_s30  ;;  %s1063_s7 = sphi %s1119_s7, %s18_s7   ;;  %s1059_s30 = sphi %s1117_s30, %s1415_s30   ;;  %s1055_s29 = sphi %s1115_s29, %s1414_s29   ;;  %s1051_s28 = sphi %s1113_s28, %s1413_s28   ;;  %s1047_s27 = sphi %s1111_s27, %s1412_s27   ;;  %s1043_s26 = sphi %s1109_s26, %s1411_s26   ;;  %s1039_s25 = sphi %s1107_s25, %s1410_s25  }
   0x8   : > { %p28_p0 = scmp.ge.s32.totalorder %s27_s0, 5  ;;  %p88_p1 = scmp.ne.s32.totalorder %s1043_s26, %s1039_s25 }
   0x9   : > { %p89_p2 = scmp.eq.s32.totalorder %s1063_s7, 0  ;;  %s81_s11 = sadd.s32 1, %s1043_s26 }
   0xa   : > { %s1417_s0 = smov (%p28_p0, %s27_s0), 0  ;;  %s1419_s1 = smov (!%p28_p0, %s30_s1), %s1059_s30 }
   0xb   : > { %p90_p3 = por %p89_p2, %p88_p1  ;;  %p32_p4 = scmp.ge.s32.totalorder %s1419_s1, 5 }
   0xc   : > { %s77_s8 = ssub.s32 %s1055_s29, %s1417_s0  ;;  %p848_p6 = scmp.ge.s32.totalorder %s1063_s7, 25 }
   0xd   : > { %s1421_s1 = smov (%p32_p4, %s1419_s1), 0 }
   0xe   : > { %s76_s9 = ssub.s32 %s1059_s30, %s1421_s1  ;;  %218 = sbr.rel (%p848_p6) target bundleno = 42 (0x2a), region = 36 }
   0xf   : > { %s78_s10 = sor.u32 %s77_s8, %s76_s9 }
  0x10   : > { %p79_p5 = scmp.eq.s32.totalorder %s78_s10, 0 }
  0x12   : > { %s1158_s12 = scalar_select %p79_p5, %s1043_s26, %s81_s11  }
  0x13   : > { %221 = sbr.rel (!%p90_p3) target bundleno = 42 (0x2a), region = 40  ;;  %s223_s13 = sand.u32 (%p90_p3), 1, %s1043_s26  }
  0x14   : > { %s950_s14 = smul.u32 (%p90_p3), 80, %s1059_s30  ;;  %s849_s15 = sshll.u32 (%p90_p3), %s223_s13, 7 }
  0x15   : > { %s225_s21 = scalar_lea.vmem (%p90_p3), [#allocation5], %s849_s15 }
  0x16   : > { %s228_s16 = sadd.s32 (%p90_p3), %s1055_s29, %s950_s14 }
  0x17   : > { %s852_s17 = sshll.u32 (%p90_p3), %s228_s16, 3 }
  0x18   : > { %s1167_s20 = scalar_lea.vmem %s1405_s2, %s852_s17 }
  0x19   : > { %v289_v0 = vld [vmem:[%s1167_s20] sm:$0xff]  ;;  %v291_v1 = vld [vmem:[%s1167_s20 + $0x28] sm:$0xff]  ;;  %v293_v2 = vld [vmem:[%s1167_s20 + $0x50] sm:$0xff] }
  0x1a   : > { %290 = vst [vmem:[%s225_s21] sm:$0xff] %v289_v0  ;;  %v295_v3 = vld [vmem:[%s1167_s20 + $0x78] sm:$0xff]  ;;  %v297_v4 = vld [vmem:[%s1167_s20 + $0xa0] sm:$0xff]  ;;  %v299_v5 = vld [vmem:[%s1167_s20 + $0xc8] sm:$0xff] }
  0x1b   : > { %292 = vst [vmem:[%s225_s21 + $0x8] sm:$0xff] %v291_v1  ;;  %v301_v6 = vld [vmem:[%s1167_s20 + $0xf0] sm:$0xff]  ;;  %v303_v7 = vld [vmem:[%s1167_s20 + $0x118] sm:$0xff]  ;;  %v305_v8 = vld [vmem:[%s1167_s20 + $0x140] sm:$0xff] }
  0x1c   : > { %294 = vst [vmem:[%s225_s21 + $0x10] sm:$0xff] %v293_v2  ;;  %v307_v9 = vld [vmem:[%s1167_s20 + $0x168] sm:$0xff]  ;;  %v309_v10 = vld [vmem:[%s1167_s20 + $0x190] sm:$0xff]  ;;  %v311_v11 = vld [vmem:[%s1167_s20 + $0x1b8] sm:$0xff] }
  0x1d   : > { %296 = vst [vmem:[%s225_s21 + $0x18] sm:$0xff] %v295_v3  ;;  %v313_v12 = vld [vmem:[%s1167_s20 + $0x1e0] sm:$0xff]  ;;  %v315_v13 = vld [vmem:[%s1167_s20 + $0x208] sm:$0xff]  ;;  %v317_v14 = vld [vmem:[%s1167_s20 + $0x230] sm:$0xff] }
  0x1e   : > { %298 = vst [vmem:[%s225_s21 + $0x20] sm:$0xff] %v297_v4  ;;  %v319_v15 = vld [vmem:[%s1167_s20 + $0x258] sm:$0xff] }
  0x1f   : > { %300 = vst [vmem:[%s225_s21 + $0x28] sm:$0xff] %v299_v5 }
  0x20   : > { %302 = vst [vmem:[%s225_s21 + $0x30] sm:$0xff] %v301_v6 }
  0x21   : > { %304 = vst [vmem:[%s225_s21 + $0x38] sm:$0xff] %v303_v7 }
  0x22   : > { %306 = vst [vmem:[%s225_s21 + $0x40] sm:$0xff] %v305_v8 }
  0x23   : > { %308 = vst [vmem:[%s225_s21 + $0x48] sm:$0xff] %v307_v9 }
  0x24   : > { %310 = vst [vmem:[%s225_s21 + $0x50] sm:$0xff] %v309_v10 }
  0x25   : > { %312 = vst [vmem:[%s225_s21 + $0x58] sm:$0xff] %v311_v11 }
  0x26   : > { %314 = vst [vmem:[%s225_s21 + $0x60] sm:$0xff] %v313_v12 }
  0x27   : > { %316 = vst [vmem:[%s225_s21 + $0x68] sm:$0xff] %v315_v13 }
  0x28   : > { %318 = vst [vmem:[%s225_s21 + $0x70] sm:$0xff] %v317_v14 }
  0x29   : > { %320 = vst [vmem:[%s225_s21 + $0x78] sm:$0xff] %v319_v15 }
  0x2a PF: > { %p853_p7 = scmp.ge.s32.totalorder %s1063_s7, 1  ;;  %p325_p8 = scmp.lt.s32.totalorder %s1063_s7, 26 }
  0x2c   : > { %p326_p9 = pnand %p853_p7, %p325_p8 }
  0x2d   : > { %s332_s22 = sand.u32 (!%p326_p9), 1, %s1039_s25   ;;  %s855_s23 = sshll.u32 (!%p326_p9), %s1051_s28, 4 }
  0x2e   : > { %329 = sbr.rel (%p326_p9) target bundleno = 443 (0x1bb), region = 78  ;;  %s854_s24 = sshll.u32 (!%p326_p9), %s332_s22, 7 }
  0x2f   : > { %p363_p10 = scmp.lt.s32.totalorder (!%p326_p9), %s855_s23, 79  ;;  %s1194_s13 = scalar_lea.vmem (!%p326_p9), [#allocation5], %s854_s24 }
  0x30   : > { %p857_p11 = scmp.ne.s32.totalorder (!%p326_p9), %s1047_s27, 0 }
  0x33   : > { %s1423_s23 = smov (!%p363_p10, %s855_s23), 79  ;;  %371 = sbr.rel (%p857_p11) target bundleno = 73 (0x49), region = 86 }
  0x34   : > { %s856_s8 = sshll.u32 %s1423_s23, 3 }
  0x35   : > { %s1192_s11 = scalar_lea.vmem %s1409_s6, %s856_s8 }
  0x38   : > { %vm372_vm0 = vcmask 523264   ;;  %v1065_v16 = vmov 0.0  }
  0x39   : > { %373 = vst.msk [vmem:[#allocation2] sm:$0xff] %vm372_vm0, %v1065_v16 }
  0x3a   : > { %374 = vst.msk [vmem:[#allocation2 + $0x8] sm:$0xff] %vm372_vm0, %v1065_v16 }
  0x3b   : > { %375 = vst.msk [vmem:[#allocation2 + $0x10] sm:$0xff] %vm372_vm0, %v1065_v16 }
  0x3c   : > { %376 = vst.msk [vmem:[#allocation2 + $0x18] sm:$0xff] %vm372_vm0, %v1065_v16 }
  0x3d   : > { %377 = vst.msk [vmem:[#allocation2 + $0x20] sm:$0xff] %vm372_vm0, %v1065_v16 }
  0x3e   : > { %378 = vst.msk [vmem:[#allocation2 + $0x28] sm:$0xff] %vm372_vm0, %v1065_v16 }
  0x3f   : > { %379 = vst.msk [vmem:[#allocation2 + $0x30] sm:$0xff] %vm372_vm0, %v1065_v16 }
  0x40   : > { %380 = vst.msk [vmem:[#allocation2 + $0x38] sm:$0xff] %vm372_vm0, %v1065_v16 }
  0x41   : > { %381 = vst.msk [vmem:[#allocation2 + $0x40] sm:$0xff] %vm372_vm0, %v1065_v16 }
  0x42   : > { %382 = vst.msk [vmem:[#allocation2 + $0x48] sm:$0xff] %vm372_vm0, %v1065_v16 }
  0x43   : > { %383 = vst.msk [vmem:[#allocation2 + $0x50] sm:$0xff] %vm372_vm0, %v1065_v16 }
  0x44   : > { %384 = vst.msk [vmem:[#allocation2 + $0x58] sm:$0xff] %vm372_vm0, %v1065_v16 }
  0x45   : > { %385 = vst.msk [vmem:[#allocation2 + $0x60] sm:$0xff] %vm372_vm0, %v1065_v16 }
  0x46   : > { %386 = vst.msk [vmem:[#allocation2 + $0x68] sm:$0xff] %vm372_vm0, %v1065_v16 }
  0x47   : > { %387 = vst.msk [vmem:[#allocation2 + $0x70] sm:$0xff] %vm372_vm0, %v1065_v16 }
  0x48   : > { %388 = vst.msk [vmem:[#allocation2 + $0x78] sm:$0xff] %vm372_vm0, %v1065_v16 }
  0x49 PF: > { %s858_s25 = sshll.u32 %s1047_s27, 7  ;;  %v431_v33 = vld [vmem:[%s1194_s13 + $0x40] sm:$0xff]  ;;  %v432_v37 = vld [vmem:[%s1194_s13 + $0x48] sm:$0xff]  ;;  %v433_v41 = vld [vmem:[%s1194_s13 + $0x50] sm:$0xff]  ;;  %vm520_vm1 = vcmask 523264   ;;  %p859_p12 = scmp.ne.s32.totalorder %s1047_s27, 4 }
  0x4a   : > { %s1217_s15 = scalar_lea.vmem %s1406_s3, %s858_s25  ;;  %v435_v34 = vld [vmem:[%s1194_s13 + $0x60] sm:$0xff]  ;;  %v436_v38 = vld [vmem:[%s1194_s13 + $0x68] sm:$0xff]  ;;  %v437_v42 = vld [vmem:[%s1194_s13 + $0x70] sm:$0xff]  ;;  %s541_s20 = sld [smem:[#allocation3]] (!%p859_p12) }
  0x4b   : > { %v406_v17 = vld [vmem:[%s1217_s15 + $0x78] sm:$0xff]  ;;  %v405_v18 = vld [vmem:[%s1217_s15 + $0x70] sm:$0xff]  ;;  %v404_v19 = vld [vmem:[%s1217_s15 + $0x68] sm:$0xff]  ;;  %s635_s17 = sld [smem:[#allocation4]] (!%p859_p12) }
  0x4c   : > { %879 = vmatpush.msra.mxu2 %v406_v17  ;;  %880 = vmatpush.msra.mxu3 %v406_v17  ;;  %v403_v20 = vld [vmem:[%s1217_s15 + $0x60] sm:$0xff]  ;;  %v402_v21 = vld [vmem:[%s1217_s15 + $0x58] sm:$0xff]  ;;  %v401_v22 = vld [vmem:[%s1217_s15 + $0x50] sm:$0xff] }
  0x4d   : > { %439 = vmatpush.msra.mxu0 %v406_v17  ;;  %878 = vmatpush.msra.mxu1 %v406_v17  ;;  %v400_v23 = vld [vmem:[%s1217_s15 + $0x48] sm:$0xff]  ;;  %v399_v24 = vld [vmem:[%s1217_s15 + $0x40] sm:$0xff]  ;;  %v398_v25 = vld [vmem:[%s1217_s15 + $0x38] sm:$0xff] }
  0x4e   : > { %882 = vmatpush.msra.mxu2 %v405_v18  ;;  %883 = vmatpush.msra.mxu3 %v405_v18  ;;  %v397_v26 = vld [vmem:[%s1217_s15 + $0x30] sm:$0xff]  ;;  %v396_v27 = vld [vmem:[%s1217_s15 + $0x28] sm:$0xff]  ;;  %v395_v28 = vld [vmem:[%s1217_s15 + $0x20] sm:$0xff] }
  0x4f   : > { %440 = vmatpush.msra.mxu0 %v405_v18  ;;  %881 = vmatpush.msra.mxu1 %v405_v18  ;;  %v394_v29 = vld [vmem:[%s1217_s15 + $0x18] sm:$0xff]  ;;  %v393_v30 = vld [vmem:[%s1217_s15 + $0x10] sm:$0xff]  ;;  %v392_v31 = vld [vmem:[%s1217_s15 + $0x8] sm:$0xff] }
  0x50   : > { %885 = vmatpush.msra.mxu2 %v404_v19  ;;  %886 = vmatpush.msra.mxu3 %v404_v19  ;;  %v391_v32 = vld [vmem:[%s1217_s15] sm:$0xff]  ;;  %v424_v39 = vld [vmem:[%s1194_s13 + $0x8] sm:$0xff]  ;;  %v425_v43 = vld [vmem:[%s1194_s13 + $0x10] sm:$0xff] }
  0x51   : > { %441 = vmatpush.msra.mxu0 %v404_v19  ;;  %884 = vmatpush.msra.mxu1 %v404_v19  ;;  %v423_v35 = vld [vmem:[%s1194_s13] sm:$0xff]  ;;  %v428_v40 = vld [vmem:[%s1194_s13 + $0x28] sm:$0xff]  ;;  %v429_v44 = vld [vmem:[%s1194_s13 + $0x30] sm:$0xff] }
  0x52   : > { %888 = vmatpush.msra.mxu2 %v403_v20  ;;  %889 = vmatpush.msra.mxu3 %v403_v20  ;;  %v427_v36 = vld [vmem:[%s1194_s13 + $0x20] sm:$0xff]  ;;  %v434_v45 = vld [vmem:[%s1194_s13 + $0x58] sm:$0xff]  ;;  %v408_v61 = vld [vmem:[#allocation2 + $0x8] sm:$0xff] }
  0x53   : > { %442 = vmatpush.msra.mxu0 %v403_v20  ;;  %887 = vmatpush.msra.mxu1 %v403_v20  ;;  %v438_v46 = vld [vmem:[%s1194_s13 + $0x78] sm:$0xff]  ;;  %v407_v49 = vld [vmem:[#allocation2] sm:$0xff]  ;;  %v412_v62 = vld [vmem:[#allocation2 + $0x28] sm:$0xff] }
  0x54   : > { %891 = vmatpush.msra.mxu2 %v402_v21  ;;  %892 = vmatpush.msra.mxu3 %v402_v21  ;;  %v426_v47 = vld [vmem:[%s1194_s13 + $0x18] sm:$0xff]  ;;  %v411_v50 = vld [vmem:[#allocation2 + $0x20] sm:$0xff]  ;;  %v416_v3 = vld [vmem:[#allocation2 + $0x48] sm:$0xff] }
  0x55   : > { %443 = vmatpush.msra.mxu0 %v402_v21  ;;  %890 = vmatpush.msra.mxu1 %v402_v21  ;;  %v430_v48 = vld [vmem:[%s1194_s13 + $0x38] sm:$0xff]  ;;  %v415_v55 = vld [vmem:[#allocation2 + $0x40] sm:$0xff]  ;;  %v420_v4 = vld [vmem:[#allocation2 + $0x68] sm:$0xff] }
  0x56   : > { %894 = vmatpush.msra.mxu2 %v401_v22  ;;  %895 = vmatpush.msra.mxu3 %v401_v22  ;;  %v419_v56 = vld [vmem:[#allocation2 + $0x60] sm:$0xff]  ;;  %v409_v9 = vld [vmem:[#allocation2 + $0x10] sm:$0xff]  ;;  %v410_v21 = vld [vmem:[#allocation2 + $0x18] sm:$0xff] }
  0x57   : > { %444 = vmatpush.msra.mxu0 %v401_v22  ;;  %893 = vmatpush.msra.mxu1 %v401_v22  ;;  %v413_v10 = vld [vmem:[#allocation2 + $0x30] sm:$0xff]  ;;  %v414_v22 = vld [vmem:[#allocation2 + $0x38] sm:$0xff] }
  0x58   : > { %897 = vmatpush.msra.mxu2 %v400_v23  ;;  %898 = vmatpush.msra.mxu3 %v400_v23  ;;  %v417_v15 = vld [vmem:[#allocation2 + $0x50] sm:$0xff] }
  0x59   : > { %445 = vmatpush.msra.mxu0 %v400_v23  ;;  %896 = vmatpush.msra.mxu1 %v400_v23  ;;  %v421_v16 = vld [vmem:[#allocation2 + $0x70] sm:$0xff] }
  0x5a   : > { %900 = vmatpush.msra.mxu2 %v399_v24  ;;  %901 = vmatpush.msra.mxu3 %v399_v24 }
  0x5b   : > { %446 = vmatpush.msra.mxu0 %v399_v24  ;;  %899 = vmatpush.msra.mxu1 %v399_v24 }
  0x5c   : > { %903 = vmatpush.msra.mxu2 %v398_v25  ;;  %904 = vmatpush.msra.mxu3 %v398_v25 }
  0x5d   : > { %447 = vmatpush.msra.mxu0 %v398_v25  ;;  %902 = vmatpush.msra.mxu1 %v398_v25 }
  0x5e   : > { %906 = vmatpush.msra.mxu2 %v397_v26  ;;  %907 = vmatpush.msra.mxu3 %v397_v26 }
  0x5f   : > { %448 = vmatpush.msra.mxu0 %v397_v26  ;;  %905 = vmatpush.msra.mxu1 %v397_v26 }
  0x60   : > { %909 = vmatpush.msra.mxu2 %v396_v27  ;;  %910 = vmatpush.msra.mxu3 %v396_v27 }
  0x61   : > { %449 = vmatpush.msra.mxu0 %v396_v27  ;;  %908 = vmatpush.msra.mxu1 %v396_v27  ;;  %v418_v27 = vld [vmem:[#allocation2 + $0x58] sm:$0xff] }
  0x62   : > { %912 = vmatpush.msra.mxu2 %v395_v28  ;;  %913 = vmatpush.msra.mxu3 %v395_v28 }
  0x63   : > { %450 = vmatpush.msra.mxu0 %v395_v28  ;;  %911 = vmatpush.msra.mxu1 %v395_v28  ;;  %v422_v28 = vld [vmem:[#allocation2 + $0x78] sm:$0xff] }
  0x64   : > { %915 = vmatpush.msra.mxu2 %v394_v29  ;;  %916 = vmatpush.msra.mxu3 %v394_v29 }
  0x65   : > { %451 = vmatpush.msra.mxu0 %v394_v29  ;;  %914 = vmatpush.msra.mxu1 %v394_v29 }
  0x66   : > { %918 = vmatpush.msra.mxu2 %v393_v30  ;;  %919 = vmatpush.msra.mxu3 %v393_v30 }
  0x67   : > { %452 = vmatpush.msra.mxu0 %v393_v30  ;;  %917 = vmatpush.msra.mxu1 %v393_v30 }
  0x68   : > { %921 = vmatpush.msra.mxu2 %v392_v31  ;;  %922 = vmatpush.msra.mxu3 %v392_v31 }
  0x69   : > { %453 = vmatpush.msra.mxu0 %v392_v31  ;;  %920 = vmatpush.msra.mxu1 %v392_v31 }
  0x6a   : > { %924 = vmatpush.msra.mxu2 %v391_v32  ;;  %925 = vmatpush.msra.mxu3 %v391_v32 }
  0x6b   : > { %479 = vmatmul.f32.vlgmr.msra.gmra.mxu2 %v431_v33  ;;  %491 = vmatmul.f32.vlgmr.msra.gmra.mxu3 %v435_v34 }
  0x6c   : > { %454 = vmatpush.msra.mxu0 %v391_v32  ;;  %923 = vmatpush.msra.mxu1 %v391_v32 }
  0x6d   : > { %455 = vmatmul.f32.vlgmr.msra.gmra.mxu0 %v423_v35  ;;  %467 = vmatmul.f32.vlgmr.msra.gmra.mxu1 %v427_v36 }
  0x73   : > { %482 = vmatmul.f32.gmra.mxu2 %v432_v37  ;;  %494 = vmatmul.f32.gmra.mxu3 %v436_v38 }
  0x75   : > { %458 = vmatmul.f32.gmra.mxu0 %v424_v39  ;;  %470 = vmatmul.f32.gmra.mxu1 %v428_v40 }
  0x7b   : > { %485 = vmatmul.f32.gmra.mxu2 %v433_v41  ;;  %497 = vmatmul.f32.gmra.mxu3 %v437_v42 }
  0x7d   : > { %461 = vmatmul.f32.gmra.mxu0 %v425_v43  ;;  %473 = vmatmul.f32.gmra.mxu1 %v429_v44 }
  0x83   : > { %488 = vmatmul.f32.gmra.mxu2 %v434_v45  ;;  %500 = vmatmul.f32.gmra.mxu3 %v438_v46 }
  0x85   : > { %464 = vmatmul.f32.gmra.mxu0 %v426_v47  ;;  %476 = vmatmul.f32.gmra.mxu1 %v430_v48 }
  0xea   : > { %v456_v51 = vpop.f32.mrf.mxu0  ;;  %v468_v52 = vpop.f32.mrf.mxu1 }
  0xeb   : > { %v504_v53 = vadd.f32 %v456_v51, %v407_v49  ;;  %v508_v54 = vadd.f32 %v468_v52, %v411_v50 }
  0xed   : > { %521 = vst.msk [vmem:[#allocation2] sm:$0xff] %vm520_vm1, %v504_v53 }
  0xee   : > { %525 = vst.msk [vmem:[#allocation2 + $0x20] sm:$0xff] %vm520_vm1, %v508_v54  ;;  %v480_v57 = vpop.f32.mrf.mxu2  ;;  %v492_v58 = vpop.f32.mrf.mxu3 }
  0xef   : > { %v512_v59 = vadd.f32 %v480_v57, %v415_v55  ;;  %v516_v60 = vadd.f32 %v492_v58, %v419_v56 }
  0xf1   : > { %529 = vst.msk [vmem:[#allocation2 + $0x40] sm:$0xff] %vm520_vm1, %v512_v59 }
  0xf2   : > { %533 = vst.msk [vmem:[#allocation2 + $0x60] sm:$0xff] %vm520_vm1, %v516_v60  ;;  %v459_v63 = vpop.f32.mrf.mxu0  ;;  %v471_v0 = vpop.f32.mrf.mxu1 }
  0xf3   : > { %v505_v1 = vadd.f32 %v459_v63, %v408_v61  ;;  %v509_v2 = vadd.f32 %v471_v0, %v412_v62 }
  0xf5   : > { %522 = vst.msk [vmem:[#allocation2 + $0x8] sm:$0xff] %vm520_vm1, %v505_v1 }
  0xf6   : > { %526 = vst.msk [vmem:[#allocation2 + $0x28] sm:$0xff] %vm520_vm1, %v509_v2  ;;  %v483_v5 = vpop.f32.mrf.mxu2  ;;  %v495_v6 = vpop.f32.mrf.mxu3 }
  0xf7   : > { %v513_v7 = vadd.f32 %v483_v5, %v416_v3  ;;  %v517_v8 = vadd.f32 %v495_v6, %v420_v4 }
  0xf9   : > { %530 = vst.msk [vmem:[#allocation2 + $0x48] sm:$0xff] %vm520_vm1, %v513_v7 }
  0xfa   : > { %534 = vst.msk [vmem:[#allocation2 + $0x68] sm:$0xff] %vm520_vm1, %v517_v8  ;;  %v462_v11 = vpop.f32.mrf.mxu0  ;;  %v474_v12 = vpop.f32.mrf.mxu1 }
  0xfb   : > { %v506_v13 = vadd.f32 %v462_v11, %v409_v9  ;;  %v510_v14 = vadd.f32 %v474_v12, %v413_v10 }
  0xfd   : > { %523 = vst.msk [vmem:[#allocation2 + $0x10] sm:$0xff] %vm520_vm1, %v506_v13 }
  0xfe   : > { %527 = vst.msk [vmem:[#allocation2 + $0x30] sm:$0xff] %vm520_vm1, %v510_v14  ;;  %v486_v17 = vpop.f32.mrf.mxu2  ;;  %v498_v18 = vpop.f32.mrf.mxu3 }
  0xff   : > { %v514_v19 = vadd.f32 %v486_v17, %v417_v15  ;;  %v518_v20 = vadd.f32 %v498_v18, %v421_v16 }
 0x101   : > { %531 = vst.msk [vmem:[#allocation2 + $0x50] sm:$0xff] %vm520_vm1, %v514_v19 }
 0x102   : > { %535 = vst.msk [vmem:[#allocation2 + $0x70] sm:$0xff] %vm520_vm1, %v518_v20  ;;  %v465_v23 = vpop.f32.mrf.mxu0  ;;  %v477_v24 = vpop.f32.mrf.mxu1 }
 0x103   : > { %v507_v25 = vadd.f32 %v465_v23, %v410_v21  ;;  %v511_v26 = vadd.f32 %v477_v24, %v414_v22 }
 0x105   : > { %524 = vst.msk [vmem:[#allocation2 + $0x18] sm:$0xff] %vm520_vm1, %v507_v25 }
 0x106   : > { %528 = vst.msk [vmem:[#allocation2 + $0x38] sm:$0xff] %vm520_vm1, %v511_v26  ;;  %v489_v29 = vpop.f32.mrf.mxu2  ;;  %v501_v30 = vpop.f32.mrf.mxu3  ;;  %540 = sbr.rel (%p859_p12) target bundleno = 443 (0x1bb), region = 90 }
 0x107   : > { %v515_v31 = vadd.f32 %v489_v29, %v418_v27  ;;  %v519_v32 = vadd.f32 %v501_v30, %v422_v28 }
 0x109   : > { %532 = vst.msk [vmem:[#allocation2 + $0x58] sm:$0xff] %vm520_vm1, %v515_v31 }
 0x10a   : > { %536 = vst.msk [vmem:[#allocation2 + $0x78] sm:$0xff] %vm520_vm1, %v519_v32 }
 0x10b   : > { %v634_v33 = vld [vmem:[%s1408_s5 + $0x38] sm:$0xff]  ;;  %v633_v34 = vld [vmem:[%s1408_s5 + $0x30] sm:$0xff]  ;;  %v632_v35 = vld [vmem:[%s1408_s5 + $0x28] sm:$0xff]  ;;  %v1290_v45 = vstv %s541_s20 }
 0x10c   : > { %927 = vmatpush.msra.mxu2 %v634_v33  ;;  %928 = vmatpush.msra.mxu3 %v634_v33  ;;  %v550_v36 = vld [vmem:[#allocation2 + $0x40] sm:$0xff]  ;;  %v630_v44 = vld [vmem:[%s1408_s5 + $0x18] sm:$0xff]  ;;  %v629_v48 = vld [vmem:[%s1408_s5 + $0x10] sm:$0xff] }
 0x10d   : > { %693 = vmatpush.msra.mxu0 %v634_v33  ;;  %926 = vmatpush.msra.mxu1 %v634_v33  ;;  %v1280_v37 = vld [vmem:[%s1407_s4] ss:$0 sm:$0xff]  ;;  %v551_v51 = vld [vmem:[#allocation2 + $0x48] sm:$0xff]  ;;  %v552_v5 = vld [vmem:[#allocation2 + $0x50] sm:$0xff] }
 0x10e   : > { %930 = vmatpush.msra.mxu2 %v633_v34  ;;  %931 = vmatpush.msra.mxu3 %v633_v34  ;;  %v554_v38 = vld [vmem:[#allocation2 + $0x60] sm:$0xff]  ;;  %v570_v42 = vadd.f32 %v1280_v37, %v550_v36  ;;  %v628_v52 = vld [vmem:[%s1408_s5 + $0x8] sm:$0xff]  ;;  %v571_v57 = vadd.f32 %v1280_v37, %v551_v51  ;;  %v556_v6 = vld [vmem:[#allocation2 + $0x70] sm:$0xff]  ;;  %v572_v13 = vadd.f32 %v1280_v37, %v552_v5 }
 0x10f   : > { %v631_v39 = vld [vmem:[%s1408_s5 + $0x20] sm:$0xff]  ;;  %694 = vmatpush.msra.mxu0 %v633_v34  ;;  %929 = vmatpush.msra.mxu1 %v633_v34  ;;  %v574_v43 = vadd.f32 %v1280_v37, %v554_v38  ;;  %v555_v54 = vld [vmem:[#allocation2 + $0x68] sm:$0xff]  ;;  %v544_v9 = vld [vmem:[#allocation2 + $0x10] sm:$0xff]  ;;  %v576_v14 = vadd.f32 %v1280_v37, %v556_v6 }
 0x110   : > { %v542_v40 = vld [vmem:[#allocation2] sm:$0xff]  ;;  %933 = vmatpush.msra.mxu2 %v632_v35  ;;  %934 = vmatpush.msra.mxu3 %v632_v35  ;;  %v603_v49 = vmul.f32 %v1290_v45, %v570_v42  ;;  %vm586_vm2 = vcmp.gt.f32.partialorder %v570_v42, 0.0  ;;  %v543_v58 = vld [vmem:[#allocation2 + $0x8] sm:$0xff]  ;;  %v575_v62 = vadd.f32 %v1280_v37, %v555_v54  ;;  %v604_v3 = vmul.f32 %v1290_v45, %v571_v57  ;;  %v548_v10 = vld [vmem:[#allocation2 + $0x30] sm:$0xff] }
 0x111   : > { %v546_v41 = vld [vmem:[#allocation2 + $0x20] sm:$0xff]  ;;  %695 = vmatpush.msra.mxu0 %v632_v35  ;;  %932 = vmatpush.msra.mxu1 %v632_v35  ;;  %v562_v46 = vadd.f32 %v1280_v37, %v542_v40  ;;  %v607_v50 = vmul.f32 %v1290_v45, %v574_v43  ;;  %vm590_vm3 = vcmp.gt.f32.partialorder %v574_v43, 0.0  ;;  %v547_v59 = vld [vmem:[#allocation2 + $0x28] sm:$0xff]  ;;  %v563_v1 = vadd.f32 %v1280_v37, %v543_v58  ;;  %v553_v21 = vld [vmem:[#allocation2 + $0x58] sm:$0xff] }
 0x112   : > { %936 = vmatpush.msra.mxu2 %v631_v39  ;;  %937 = vmatpush.msra.mxu3 %v631_v39  ;;  %v566_v47 = vadd.f32 %v1280_v37, %v546_v41  ;;  %v627_v56 = vld [vmem:[%s1408_s5] sm:$0xff]  ;;  %v619_v60 = vsel %vm586_vm2, %v570_v42, %v603_v49  ;;  %v567_v2 = vadd.f32 %v1280_v37, %v547_v59  ;;  %vm587_vm6 = vcmp.gt.f32.partialorder %v571_v57, 0.0  ;;  %v557_v22 = vld [vmem:[#allocation2 + $0x78] sm:$0xff] }
 0x113   : > { %696 = vmatpush.msra.mxu0 %v631_v39  ;;  %935 = vmatpush.msra.mxu1 %v631_v39  ;;  %v595_v53 = vmul.f32 %v1290_v45, %v562_v46  ;;  %vm578_vm4 = vcmp.gt.f32.partialorder %v562_v46, 0.0  ;;  %v623_v61 = vsel %vm590_vm3, %v574_v43, %v607_v50  ;;  %v608_v4 = vmul.f32 %v1290_v45, %v575_v62  ;;  %v545_v25 = vld [vmem:[#allocation2 + $0x18] sm:$0xff] }
 0x114   : > { %939 = vmatpush.msra.mxu2 %v630_v44  ;;  %940 = vmatpush.msra.mxu3 %v630_v44  ;;  %v599_v55 = vmul.f32 %v1290_v45, %v566_v47  ;;  %vm582_vm5 = vcmp.gt.f32.partialorder %v566_v47, 0.0  ;;  %vm591_vm7 = vcmp.gt.f32.partialorder %v575_v62, 0.0  ;;  %v596_v7 = vmul.f32 %v1290_v45, %v563_v1  ;;  %v549_v26 = vld [vmem:[#allocation2 + $0x38] sm:$0xff] }
 0x115   : > { %697 = vmatpush.msra.mxu0 %v630_v44  ;;  %938 = vmatpush.msra.mxu1 %v630_v44  ;;  %v611_v63 = vsel %vm578_vm4, %v562_v46, %v595_v53  ;;  %v600_v8 = vmul.f32 %v1290_v45, %v567_v2  ;;  %vm579_vm8 = vcmp.gt.f32.partialorder %v563_v1, 0.0  ;;  %vm583_vm9 = vcmp.gt.f32.partialorder %v567_v2, 0.0 }
 0x116   : > { %942 = vmatpush.msra.mxu2 %v629_v48  ;;  %943 = vmatpush.msra.mxu3 %v629_v48  ;;  %v615_v0 = vsel %vm582_vm5, %v566_v47, %v599_v55  ;;  %v620_v11 = vsel %vm587_vm6, %v571_v57, %v604_v3  ;;  %v624_v12 = vsel %vm591_vm7, %v575_v62, %v608_v4  ;;  %vm588_vm10 = vcmp.gt.f32.partialorder %v572_v13, 0.0 }
 0x117   : > { %698 = vmatpush.msra.mxu0 %v629_v48  ;;  %941 = vmatpush.msra.mxu1 %v629_v48  ;;  %v612_v15 = vsel %vm579_vm8, %v563_v1, %v596_v7  ;;  %v616_v16 = vsel %vm583_vm9, %v567_v2, %v600_v8  ;;  %v564_v17 = vadd.f32 %v1280_v37, %v544_v9  ;;  %vm592_vm11 = vcmp.gt.f32.partialorder %v576_v14, 0.0 }
 0x118   : > { %945 = vmatpush.msra.mxu2 %v628_v52  ;;  %946 = vmatpush.msra.mxu3 %v628_v52  ;;  %v568_v18 = vadd.f32 %v1280_v37, %v548_v10  ;;  %v605_v19 = vmul.f32 %v1290_v45, %v572_v13  ;;  %v609_v20 = vmul.f32 %v1290_v45, %v576_v14  ;;  %v636_v43 = vstv %s635_s17 }
 0x119   : > { %699 = vmatpush.msra.mxu0 %v628_v52  ;;  %944 = vmatpush.msra.mxu1 %v628_v52  ;;  %v597_v23 = vmul.f32 %v1290_v45, %v564_v17  ;;  %vm580_vm12 = vcmp.gt.f32.partialorder %v564_v17, 0.0  ;;  %v573_v29 = vadd.f32 %v1280_v37, %v553_v21  ;;  %v577_v30 = vadd.f32 %v1280_v37, %v557_v22 }
 0x11a   : > { %948 = vmatpush.msra.mxu2 %v627_v56  ;;  %949 = vmatpush.msra.mxu3 %v627_v56  ;;  %v601_v24 = vmul.f32 %v1290_v45, %v568_v18  ;;  %vm584_vm13 = vcmp.gt.f32.partialorder %v568_v18, 0.0  ;;  %v621_v27 = vsel %vm588_vm10, %v572_v13, %v605_v19  ;;  %v625_v28 = vsel %vm592_vm11, %v576_v14, %v609_v20 }
 0x11b   : > { %868 = vmatmul.msk.f32.vlgmr.msra.gmra.mxu2 %vm520_vm1, %v619_v60  ;;  %872 = vmatmul.msk.f32.vlgmr.msra.gmra.mxu3 %vm520_vm1, %v623_v61  ;;  %v613_v31 = vsel %vm580_vm12, %v564_v17, %v597_v23  ;;  %v565_v33 = vadd.f32 %v1280_v37, %v545_v25  ;;  %v569_v34 = vadd.f32 %v1280_v37, %v549_v26  ;;  %vm589_vm14 = vcmp.gt.f32.partialorder %v573_v29, 0.0 }
 0x11c   : > { %700 = vmatpush.msra.mxu0 %v627_v56  ;;  %947 = vmatpush.msra.mxu1 %v627_v56  ;;  %v617_v32 = vsel %vm584_vm13, %v568_v18, %v601_v24  ;;  %v606_v35 = vmul.f32 %v1290_v45, %v573_v29  ;;  %v610_v36 = vmul.f32 %v1290_v45, %v577_v30  ;;  %vm593_vm15 = vcmp.gt.f32.partialorder %v577_v30, 0.0 }
 0x11d   : > { %860 = vmatmul.msk.f32.vlgmr.msra.gmra.mxu0 %vm520_vm1, %v611_v63  ;;  %864 = vmatmul.msk.f32.vlgmr.msra.gmra.mxu1 %vm520_vm1, %v615_v0  ;;  %v598_v38 = vmul.f32 %v1290_v45, %v565_v33  ;;  %v602_v39 = vmul.f32 %v1290_v45, %v569_v34  ;;  %vm581_vm0 = vcmp.gt.f32.partialorder %v565_v33, 0.0  ;;  %vm585_vm2 = vcmp.gt.f32.partialorder %v569_v34, 0.0 }
 0x11e   : > { %v622_v37 = vsel %vm589_vm14, %v573_v29, %v606_v35  ;;  %v626_v40 = vsel %vm593_vm15, %v577_v30, %v610_v36  ;;  %vm750_vm3 = vcmask 15360  }
 0x11f   : > { %v614_v41 = vsel %vm581_vm0, %v565_v33, %v598_v38  ;;  %v618_v42 = vsel %vm585_vm2, %v569_v34, %v602_v39 }
 0x123   : > { %869 = vmatmul.msk.f32.gmra.mxu2 %vm520_vm1, %v620_v11  ;;  %873 = vmatmul.msk.f32.gmra.mxu3 %vm520_vm1, %v624_v12 }
 0x125   : > { %861 = vmatmul.msk.f32.gmra.mxu0 %vm520_vm1, %v612_v15  ;;  %865 = vmatmul.msk.f32.gmra.mxu1 %vm520_vm1, %v616_v16 }
 0x12b   : > { %870 = vmatmul.msk.f32.gmra.mxu2 %vm520_vm1, %v621_v27  ;;  %874 = vmatmul.msk.f32.gmra.mxu3 %vm520_vm1, %v625_v28 }
 0x12d   : > { %862 = vmatmul.msk.f32.gmra.mxu0 %vm520_vm1, %v613_v31  ;;  %866 = vmatmul.msk.f32.gmra.mxu1 %vm520_vm1, %v617_v32 }
 0x133   : > { %871 = vmatmul.msk.f32.gmra.mxu2 %vm520_vm1, %v622_v37  ;;  %875 = vmatmul.msk.f32.gmra.mxu3 %vm520_vm1, %v626_v40 }
 0x135   : > { %863 = vmatmul.msk.f32.gmra.mxu0 %vm520_vm1, %v614_v41  ;;  %867 = vmatmul.msk.f32.gmra.mxu1 %vm520_vm1, %v618_v42 }
 0x19a   : > { %v702_v44 = vpop.f32.mrf.mxu0  ;;  %v714_v45 = vpop.f32.mrf.mxu1 }
 0x19b   : > { %v703_v46 = vadd.f32 %v702_v44, %v636_v43  ;;  %v715_v47 = vadd.f32 %v714_v45, %v636_v43 }
 0x19d   : > { %751 = vst.msk [vmem:[%s1192_s11] sm:$0xff] %vm750_vm3, %v703_v46 }
 0x19e   : > { %755 = vst.msk [vmem:[%s1192_s11 + $0x20] sm:$0xff] %vm750_vm3, %v715_v47  ;;  %v726_v48 = vpop.f32.mrf.mxu2  ;;  %v738_v49 = vpop.f32.mrf.mxu3 }
 0x19f   : > { %v727_v50 = vadd.f32 %v726_v48, %v636_v43  ;;  %v739_v51 = vadd.f32 %v738_v49, %v636_v43 }
 0x1a1   : > { %759 = vst.msk [vmem:[%s1192_s11 + $0x40] sm:$0xff] %vm750_vm3, %v727_v50 }
 0x1a2   : > { %763 = vst.msk [vmem:[%s1192_s11 + $0x60] sm:$0xff] %vm750_vm3, %v739_v51  ;;  %v705_v52 = vpop.f32.mrf.mxu0  ;;  %v717_v53 = vpop.f32.mrf.mxu1 }
 0x1a3   : > { %v706_v54 = vadd.f32 %v705_v52, %v636_v43  ;;  %v718_v55 = vadd.f32 %v717_v53, %v636_v43 }
 0x1a5   : > { %752 = vst.msk [vmem:[%s1192_s11 + $0x8] sm:$0xff] %vm750_vm3, %v706_v54 }
 0x1a6   : > { %756 = vst.msk [vmem:[%s1192_s11 + $0x28] sm:$0xff] %vm750_vm3, %v718_v55  ;;  %v729_v56 = vpop.f32.mrf.mxu2  ;;  %v741_v57 = vpop.f32.mrf.mxu3 }
 0x1a7   : > { %v730_v58 = vadd.f32 %v729_v56, %v636_v43  ;;  %v742_v59 = vadd.f32 %v741_v57, %v636_v43 }
 0x1a9   : > { %760 = vst.msk [vmem:[%s1192_s11 + $0x48] sm:$0xff] %vm750_vm3, %v730_v58 }
 0x1aa   : > { %764 = vst.msk [vmem:[%s1192_s11 + $0x68] sm:$0xff] %vm750_vm3, %v742_v59  ;;  %v708_v60 = vpop.f32.mrf.mxu0  ;;  %v720_v61 = vpop.f32.mrf.mxu1 }
 0x1ab   : > { %v709_v62 = vadd.f32 %v708_v60, %v636_v43  ;;  %v721_v63 = vadd.f32 %v720_v61, %v636_v43 }
 0x1ad   : > { %753 = vst.msk [vmem:[%s1192_s11 + $0x10] sm:$0xff] %vm750_vm3, %v709_v62 }
 0x1ae   : > { %757 = vst.msk [vmem:[%s1192_s11 + $0x30] sm:$0xff] %vm750_vm3, %v721_v63  ;;  %v732_v0 = vpop.f32.mrf.mxu2  ;;  %v744_v1 = vpop.f32.mrf.mxu3 }
 0x1af   : > { %v733_v2 = vadd.f32 %v732_v0, %v636_v43  ;;  %v745_v3 = vadd.f32 %v744_v1, %v636_v43 }
 0x1b1   : > { %761 = vst.msk [vmem:[%s1192_s11 + $0x50] sm:$0xff] %vm750_vm3, %v733_v2 }
 0x1b2   : > { %765 = vst.msk [vmem:[%s1192_s11 + $0x70] sm:$0xff] %vm750_vm3, %v745_v3  ;;  %v711_v4 = vpop.f32.mrf.mxu0  ;;  %v723_v5 = vpop.f32.mrf.mxu1 }
 0x1b3   : > { %v712_v6 = vadd.f32 %v711_v4, %v636_v43  ;;  %v724_v7 = vadd.f32 %v723_v5, %v636_v43 }
 0x1b5   : > { %754 = vst.msk [vmem:[%s1192_s11 + $0x18] sm:$0xff] %vm750_vm3, %v712_v6 }
 0x1b6   : > { %758 = vst.msk [vmem:[%s1192_s11 + $0x38] sm:$0xff] %vm750_vm3, %v724_v7  ;;  %v735_v8 = vpop.f32.mrf.mxu2  ;;  %v747_v9 = vpop.f32.mrf.mxu3 }
 0x1b7   : > { %v736_v10 = vadd.f32 %v735_v8, %v636_v43  ;;  %v748_v11 = vadd.f32 %v747_v9, %v636_v43 }
 0x1b9   : > { %762 = vst.msk [vmem:[%s1192_s11 + $0x58] sm:$0xff] %vm750_vm3, %v736_v10 }
 0x1ba   : > { %766 = vst.msk [vmem:[%s1192_s11 + $0x78] sm:$0xff] %vm750_vm3, %v748_v11 }
 0x1bb PF: > { %s18_s7 = sadd.s32 1, %s1063_s7   ;;  %s1410_s25 = smov %s1043_s26 }
 0x1bc   : > { %p15_p13 = scmp.ge.s32.totalorder %s18_s7, 27   ;;  %s1411_s26 = smov %s1158_s12 }
 0x1bd   : > { %s1412_s27 = smov %s1055_s29  ;;  %s1413_s28 = smov %s1059_s30 }
 0x1be   : > { %s1414_s29 = smov %s1417_s0  ;;  %s1415_s30 = smov %s1421_s1 }
 0x1bf   :  { %17 = sbr.rel (!%p15_p13) target bundleno = 7 (0x7), region = 126 }

</bundles_post_ra>
